<compile_context>
chip_gen: v6e
topology: v6e:2x2x1
jax: 0.10.0
libtpu: 0.0.40
codegen_flags: <defaults>
</compile_context>

<pallas_src>
import jax
import jax.numpy as jnp
from jax import lax
from jax.experimental import pallas as pl
from jax.experimental.pallas import tpu as pltpu


def _critic_adv_kernel(x_ref, w1_ref, b1_ref, w2_ref, b2_ref,
                       w3_ref, b3_ref, w4_ref, b4_ref, o_ref):
    x = x_ref[...]                                             # (TB, S) f32

    # Layer 1, feature-major: contract the S axis of both operands,
    #   (M, S) ._S (TB, S) -> (M, TB); batch lands on lanes, no transpose.
    h = lax.dot_general(w1_ref[...], x, (((1,), (1,)), ((), ())),
                        preferred_element_type=jnp.float32)    # (M, TB)
    h = jnp.maximum(h + b1_ref[...], 0.0)

    # Layers 2 & 3: plain (M, M) @ (M, TB) matmuls, kept in f32 (VMEM-only).
    h = jnp.maximum(
        jnp.dot(w2_ref[...], h, preferred_element_type=jnp.float32) + b2_ref[...],
        0.0)
    h = jnp.maximum(
        jnp.dot(w3_ref[...], h, preferred_element_type=jnp.float32) + b3_ref[...],
        0.0)

    # Final Linear(M, 1): (1, M) @ (M, TB) -> lane-dense (1, TB) row.
    q = jnp.dot(w4_ref[...], h, preferred_element_type=jnp.float32) + b4_ref[...]
    o_ref[...] = q.astype(o_ref.dtype)


def _round_up(x, m):
    return ((x + m - 1) // m) * m


def critic_adv_forward(state, params, *, block_b=16384):
    """Pallas implementation of CriticAdv.forward(state) -> (B, 1) value."""
    w1, b1 = params["w1"], params["b1"]
    w2, b2 = params["w2"], params["b2"]
    w3, b3 = params["w3"], params["b3"]
    w4, b4 = params["w4"], params["b4"]

    B, S = state.shape
    M = w1.shape[0]

    state = state.astype(jnp.float32)          # no-op for f32 inputs

    # Tile selection: single tile only for tiny batches; otherwise >= 2
    # lane-aligned tiles (feeds both TensorCores on v7x), capped at block_b.
    if B <= 256:
        TB = B
    else:
        TB = min(_round_up(block_b, 128), _round_up(pl.cdiv(B, 2), 128))
    nb = pl.cdiv(B, TB)

    # Tiny resident parameters (f32, PyTorch layout; biases made 2-D).
    w1c, w2c, w3c, w4c = (w.astype(jnp.float32) for w in (w1, w2, w3, w4))
    b1c, b2c, b3c = (b.reshape(-1, 1).astype(jnp.float32) for b in (b1, b2, b3))
    b4c = b4.reshape(1, 1).astype(jnp.float32)

    resident = lambda a: pl.BlockSpec(a.shape, lambda i: (0, 0))   # stays in VMEM

    param_bytes = 4 * sum(int(a.size)
                          for a in (w1c, w2c, w3c, w4c, b1c, b2c, b3c, b4c))
    cost = pl.CostEstimate(
        flops=2 * B * (S * M + 2 * M * M + M),
        transcendentals=0,
        bytes_accessed=4 * B * S + 4 * B + param_bytes)

    q_row = pl.pallas_call(
        _critic_adv_kernel,
        out_shape=jax.ShapeDtypeStruct((1, B), jnp.float32),
        grid=(nb,),
        in_specs=[pl.BlockSpec((TB, S), lambda i: (i, 0)),
                  resident(w1c), resident(b1c),
                  resident(w2c), resident(b2c),
                  resident(w3c), resident(b3c),
                  resident(w4c), resident(b4c)],
        out_specs=pl.BlockSpec((1, TB), lambda i: (0, i)),
        compiler_params=pltpu.CompilerParams(
            dimension_semantics=("parallel",),   # megacore split on v7x
            vmem_limit_bytes=32 << 20,           # few-MiB footprint; safe on 64 MiB v7x
        ),
        cost_estimate=cost,
    )(state, w1c, b1c, w2c, b2c, w3c, b3c, w4c, b4c)

    # (1, B) row-major -> (B, 1); only the first B lanes are ever written with
    # valid data (edge-block padding lanes are masked on store).
    return q_row.reshape(B, 1)


def init_params(key, state_dim, mid_dim):
    """Deterministic init mimicking PyTorch nn.Linear (uniform +-1/sqrt(fan_in))."""
    def linear(k, fan_in, fan_out):
        kw, kb = jax.random.split(k)
        bound = 1.0 / jnp.sqrt(fan_in)
        w = jax.random.uniform(kw, (fan_out, fan_in), jnp.float32, -bound, bound)
        b = jax.random.uniform(kb, (fan_out,), jnp.float32, -bound, bound)
        return w, b

    k1, k2, k3, k4 = jax.random.split(key, 4)
    w1, b1 = linear(k1, state_dim, mid_dim)
    w2, b2 = linear(k2, mid_dim, mid_dim)
    w3, b3 = linear(k3, mid_dim, mid_dim)
    w4, b4 = linear(k4, mid_dim, 1)
    return dict(w1=w1, b1=b1, w2=w2, b2=b2, w3=w3, b3=b3, w4=w4, b4=b4)


def _reference_forward(state, p):
    h = jnp.maximum(state @ p["w1"].T + p["b1"], 0.0)
    h = jnp.maximum(h @ p["w2"].T + p["b2"], 0.0)
    h = jnp.maximum(h @ p["w3"].T + p["b3"], 0.0)
    return h @ p["w4"].T + p["b4"]


if __name__ == "__main__":
    state_dim, mid_dim = 16, 32

    key = jax.random.PRNGKey(0)
    kp, ks1, ks2 = jax.random.split(key, 3)
    params = init_params(kp, state_dim, mid_dim)

    # Tolerance covers the case where the MXU evaluates f32 matmuls at
    # reduced (bf16-pass) input precision under default precision settings.
    ATOL = RTOL = 2e-2

    # 1) Small single-tile case (grid=(1,)).
    state_small = jax.random.normal(ks1, (8, state_dim), jnp.float32)
    q_small = jax.block_until_ready(critic_adv_forward(state_small, params))
    q_small_ref = _reference_forward(state_small, params)
    assert q_small.shape == (8, 1)
    assert jnp.allclose(q_small, q_small_ref, atol=ATOL, rtol=RTOL), "small mismatch"

    # 2) Multi-tile parallel grid with a ragged edge block
    #    (B=300, block_b=128 -> TB=128, 3 tiles, last tile masked).
    state_big = jax.random.normal(ks2, (300, state_dim), jnp.float32)
    q_big = jax.block_until_ready(
        critic_adv_forward(state_big, params, block_b=128))
    q_big_ref = _reference_forward(state_big, params)
    assert q_big.shape == (300, 1)
    assert jnp.allclose(q_big, q_big_ref, atol=ATOL, rtol=RTOL), "tiled mismatch"

    print("KERNEL_OK")
</pallas_src>

<mosaic_0001>
module attributes {stable_mosaic.version = 11 : i64} {
  func.func @_critic_adv_kernel(%arg0: i32, %arg1: memref<8x16xf32, #tpu.memory_space<vmem>>, %arg2: memref<32x16xf32, #tpu.memory_space<vmem>>, %arg3: memref<32x1xf32, #tpu.memory_space<vmem>>, %arg4: memref<32x32xf32, #tpu.memory_space<vmem>>, %arg5: memref<32x1xf32, #tpu.memory_space<vmem>>, %arg6: memref<32x32xf32, #tpu.memory_space<vmem>>, %arg7: memref<32x1xf32, #tpu.memory_space<vmem>>, %arg8: memref<1x32xf32, #tpu.memory_space<vmem>>, %arg9: memref<1x1xf32, #tpu.memory_space<vmem>>, %arg10: memref<1x8xf32, #tpu.memory_space<vmem>>) attributes {dimension_semantics = [#tpu.dimension_semantics<parallel>], iteration_bounds = array<i64: 1>, scalar_prefetch = 0 : i64, scratch_operands = 0 : i64, tpu.core_type = #tpu.core_type<tc>, window_params = [{transform_indices = @transform_0, window_bounds = array<i64: 8, 16>}, {pipeline_mode = #tpu.pipeline_mode<synchronous>, transform_indices = @transform_1, window_bounds = array<i64: 32, 16>}, {pipeline_mode = #tpu.pipeline_mode<synchronous>, transform_indices = @transform_2, window_bounds = array<i64: 32, 1>}, {pipeline_mode = #tpu.pipeline_mode<synchronous>, transform_indices = @transform_3, window_bounds = array<i64: 32, 32>}, {pipeline_mode = #tpu.pipeline_mode<synchronous>, transform_indices = @transform_4, window_bounds = array<i64: 32, 1>}, {pipeline_mode = #tpu.pipeline_mode<synchronous>, transform_indices = @transform_5, window_bounds = array<i64: 32, 32>}, {pipeline_mode = #tpu.pipeline_mode<synchronous>, transform_indices = @transform_6, window_bounds = array<i64: 32, 1>}, {pipeline_mode = #tpu.pipeline_mode<synchronous>, transform_indices = @transform_7, window_bounds = array<i64: 1, 32>}, {pipeline_mode = #tpu.pipeline_mode<synchronous>, transform_indices = @transform_8, window_bounds = array<i64: 1, 1>}, {transform_indices = @transform_9, window_bounds = array<i64: 1, 8>}]} {
    %c0 = arith.constant 0 : index
    %c0_0 = arith.constant 0 : index
    %0 = vector.load %arg1[%c0, %c0_0] : memref<8x16xf32, #tpu.memory_space<vmem>>, vector<8x16xf32>
    %c0_1 = arith.constant 0 : index
    %c0_2 = arith.constant 0 : index
    %1 = vector.load %arg2[%c0_1, %c0_2] : memref<32x16xf32, #tpu.memory_space<vmem>>, vector<32x16xf32>
    %cst = arith.constant dense<0.000000e+00> : vector<32x8xf32>
    %2 = tpu.matmul %1, %0, %cst {dimension_numbers = #tpu.dot_dimension_numbers<[1], [1], [0], [0], [0, 0, 1, 0], [], []>} : vector<32x16xf32>, vector<8x16xf32>, vector<32x8xf32> -> vector<32x8xf32>
    %c0_3 = arith.constant 0 : index
    %c0_4 = arith.constant 0 : index
    %3 = vector.load %arg3[%c0_3, %c0_4] : memref<32x1xf32, #tpu.memory_space<vmem>>, vector<32x1xf32>
    %4 = vector.broadcast %3 : vector<32x1xf32> to vector<32x8xf32>
    %5 = arith.addf %2, %4 : vector<32x8xf32>
    %cst_5 = arith.constant 0.000000e+00 : f32
    %6 = vector.broadcast %cst_5 : f32 to vector<32x8xf32>
    %7 = arith.maximumf %5, %6 : vector<32x8xf32>
    %c0_6 = arith.constant 0 : index
    %c0_7 = arith.constant 0 : index
    %8 = vector.load %arg4[%c0_6, %c0_7] : memref<32x32xf32, #tpu.memory_space<vmem>>, vector<32x32xf32>
    %cst_8 = arith.constant dense<0.000000e+00> : vector<32x8xf32>
    %9 = tpu.matmul %8, %7, %cst_8 {dimension_numbers = #tpu.dot_dimension_numbers<[1], [0], [0], [1], [0, 0, 1, 1], [], []>} : vector<32x32xf32>, vector<32x8xf32>, vector<32x8xf32> -> vector<32x8xf32>
    %c0_9 = arith.constant 0 : index
    %c0_10 = arith.constant 0 : index
    %10 = vector.load %arg5[%c0_9, %c0_10] : memref<32x1xf32, #tpu.memory_space<vmem>>, vector<32x1xf32>
    %11 = vector.broadcast %10 : vector<32x1xf32> to vector<32x8xf32>
    %12 = arith.addf %9, %11 : vector<32x8xf32>
    %cst_11 = arith.constant 0.000000e+00 : f32
    %13 = vector.broadcast %cst_11 : f32 to vector<32x8xf32>
    %14 = arith.maximumf %12, %13 : vector<32x8xf32>
    %c0_12 = arith.constant 0 : index
    %c0_13 = arith.constant 0 : index
    %15 = vector.load %arg6[%c0_12, %c0_13] : memref<32x32xf32, #tpu.memory_space<vmem>>, vector<32x32xf32>
    %cst_14 = arith.constant dense<0.000000e+00> : vector<32x8xf32>
    %16 = tpu.matmul %15, %14, %cst_14 {dimension_numbers = #tpu.dot_dimension_numbers<[1], [0], [0], [1], [0, 0, 1, 1], [], []>} : vector<32x32xf32>, vector<32x8xf32>, vector<32x8xf32> -> vector<32x8xf32>
    %c0_15 = arith.constant 0 : index
    %c0_16 = arith.constant 0 : index
    %17 = vector.load %arg7[%c0_15, %c0_16] : memref<32x1xf32, #tpu.memory_space<vmem>>, vector<32x1xf32>
    %18 = vector.broadcast %17 : vector<32x1xf32> to vector<32x8xf32>
    %19 = arith.addf %16, %18 : vector<32x8xf32>
    %cst_17 = arith.constant 0.000000e+00 : f32
    %20 = vector.broadcast %cst_17 : f32 to vector<32x8xf32>
    %21 = arith.maximumf %19, %20 : vector<32x8xf32>
    %c0_18 = arith.constant 0 : index
    %c0_19 = arith.constant 0 : index
    %22 = vector.load %arg8[%c0_18, %c0_19] : memref<1x32xf32, #tpu.memory_space<vmem>>, vector<1x32xf32>
    %cst_20 = arith.constant dense<0.000000e+00> : vector<1x8xf32>
    %23 = tpu.matmul %22, %21, %cst_20 {dimension_numbers = #tpu.dot_dimension_numbers<[1], [0], [0], [1], [0, 0, 1, 1], [], []>} : vector<1x32xf32>, vector<32x8xf32>, vector<1x8xf32> -> vector<1x8xf32>
    %c0_21 = arith.constant 0 : index
    %c0_22 = arith.constant 0 : index
    %24 = vector.load %arg9[%c0_21, %c0_22] : memref<1x1xf32, #tpu.memory_space<vmem>>, vector<1x1xf32>
    %25 = vector.broadcast %24 : vector<1x1xf32> to vector<1x8xf32>
    %26 = arith.addf %23, %25 : vector<1x8xf32>
    %c0_23 = arith.constant 0 : index
    %c0_24 = arith.constant 0 : index
    %27 = vector.load %arg10[%c0_23, %c0_24] : memref<1x8xf32, #tpu.memory_space<vmem>>, vector<1x8xf32>
    tpu.vector_store %arg10[%c0_23, %c0_24], %26 {strides = array<i32>} : memref<1x8xf32, #tpu.memory_space<vmem>>, vector<1x8xf32>,
    return
  }
  func.func @transform_0(%arg0: i32) -> (i32, i32) {
    %c0_i32 = arith.constant 0 : i32
    %c0_i32_0 = arith.constant 0 : i32
    return %arg0, %c0_i32 : i32, i32
  }
  func.func @transform_1(%arg0: i32) -> (i32, i32) {
    %c0_i32 = arith.constant 0 : i32
    %c0_i32_0 = arith.constant 0 : i32
    %c0_i32_1 = arith.constant 0 : i32
    return %c0_i32, %c0_i32_0 : i32, i32
  }
  func.func @transform_2(%arg0: i32) -> (i32, i32) {
    %c0_i32 = arith.constant 0 : i32
    %c0_i32_0 = arith.constant 0 : i32
    %c0_i32_1 = arith.constant 0 : i32
    return %c0_i32, %c0_i32_0 : i32, i32
  }
  func.func @transform_3(%arg0: i32) -> (i32, i32) {
    %c0_i32 = arith.constant 0 : i32
    %c0_i32_0 = arith.constant 0 : i32
    %c0_i32_1 = arith.constant 0 : i32
    return %c0_i32, %c0_i32_0 : i32, i32
  }
  func.func @transform_4(%arg0: i32) -> (i32, i32) {
    %c0_i32 = arith.constant 0 : i32
    %c0_i32_0 = arith.constant 0 : i32
    %c0_i32_1 = arith.constant 0 : i32
    return %c0_i32, %c0_i32_0 : i32, i32
  }
  func.func @transform_5(%arg0: i32) -> (i32, i32) {
    %c0_i32 = arith.constant 0 : i32
    %c0_i32_0 = arith.constant 0 : i32
    %c0_i32_1 = arith.constant 0 : i32
    return %c0_i32, %c0_i32_0 : i32, i32
  }
  func.func @transform_6(%arg0: i32) -> (i32, i32) {
    %c0_i32 = arith.constant 0 : i32
    %c0_i32_0 = arith.constant 0 : i32
    %c0_i32_1 = arith.constant 0 : i32
    return %c0_i32, %c0_i32_0 : i32, i32
  }
  func.func @transform_7(%arg0: i32) -> (i32, i32) {
    %c0_i32 = arith.constant 0 : i32
    %c0_i32_0 = arith.constant 0 : i32
    %c0_i32_1 = arith.constant 0 : i32
    return %c0_i32, %c0_i32_0 : i32, i32
  }
  func.func @transform_8(%arg0: i32) -> (i32, i32) {
    %c0_i32 = arith.constant 0 : i32
    %c0_i32_0 = arith.constant 0 : i32
    %c0_i32_1 = arith.constant 0 : i32
    return %c0_i32, %c0_i32_0 : i32, i32
  }
  func.func @transform_9(%arg0: i32) -> (i32, i32) {
    %c0_i32 = arith.constant 0 : i32
    %c0_i32_0 = arith.constant 0 : i32
    return %c0_i32, %arg0 : i32, i32
  }
}

</mosaic_0001>

<bundles_post_ra>
// kernel: tpu_custom_call.1
= control target key start
LH: loop header
LB: loop body
LE: loop exit
PB: predicated region body
PF: predicated region fallthrough
CT: control target
= control target key end

     0   :  { %s796_s0 = inlined_call_operand.vmem [shape: f32[8,16], index: 0, kind: input, shape index: {}]   ;;  %s797_s1 = inlined_call_operand.vmem [shape: f32[32,16], index: 1, kind: input, shape index: {}]   ;;  %s798_s2 = inlined_call_operand.vmem [shape: f32[32,1], index: 2, kind: input, shape index: {}]   ;;  %s799_s3 = inlined_call_operand.vmem [shape: f32[32,32], index: 3, kind: input, shape index: {}]   ;;  %s800_s4 = inlined_call_operand.vmem [shape: f32[32,1], index: 4, kind: input, shape index: {}]   ;;  %s801_s5 = inlined_call_operand.vmem [shape: f32[32,32], index: 5, kind: input, shape index: {}]   ;;  %s802_s6 = inlined_call_operand.vmem [shape: f32[32,1], index: 6, kind: input, shape index: {}]   ;;  %s803_s7 = inlined_call_operand.vmem [shape: f32[1,32], index: 7, kind: input, shape index: {}]   ;;  %s804_s8 = inlined_call_operand.<no memory space> [shape: f32[1,1], index: 8, kind: input, shape index: {}]   ;;  %s805_s9 = inlined_call_operand.hbm [shape: f32[1,8], index: 9, kind: output, shape index: {}]  }
   0x1   :  { %v14_v0 = vstv %s804_s8 }
   0x2   :  { %15 = vst [vmem:[#allocation2] sm:$0x1] %v14_v0 }
   0x3   :  { %v35_v1 = vld [vmem:[%s796_s0] sm:$0xff]  ;;  %vm64_vm0 = vcmask 130048   ;;  %v43_v3 = vld [vmem:[%s798_s2 + $0x18] sm:$0xff]  ;;  %v37_v4 = vld [vmem:[%s797_s1 + $0x8] sm:$0xff]  ;;  %v643_v5 = vmov 0  }
   0x4   :  { %v36_v2 = vld [vmem:[%s797_s1] sm:$0xff]  ;;  %568 = vmatprep.subr.msk.mxu0 %vm64_vm0, %v35_v1  ;;  %619 = vset.pattern.permute.xlu0 %v643_v5  ;;  %v41_v6 = vld [vmem:[%s798_s2 + $0x8] sm:$0xff]  ;;  %v38_v7 = vld [vmem:[%s797_s1 + $0x10] sm:$0xff] }
   0x5   :  { %570 = vmatprep.mubr.msk.f32.mxu0 %vm64_vm0, %v36_v2  ;;  %569 = vmatpush3.xpose.msk.msra.mxu0 %vm64_vm0, %v35_v1  ;;  %v42_v8 = vld [vmem:[%s798_s2 + $0x10] sm:$0xff]  ;;  %v40_v9 = vld [vmem:[%s798_s2] sm:$0xff]  ;;  %v39_v10 = vld [vmem:[%s797_s1 + $0x18] sm:$0xff] }
   0x6   :  { %61 = vperm.xlu0 %619, %v43_v3   ;;  %620 = vset.pattern.permute.xlu1 %v643_v5 }
   0x7   :  { %51 = vperm.xlu1 %620, %v41_v6  }
   0x8   :  { %571 = vmatmul.mubr.msk.f32.vlgmr.msra.gmra.mxu0 %vm64_vm0, %v37_v4 }
   0x9   :  { %573 = vmatprep.mubr.msk.f32.mxu0 %vm64_vm0, %v38_v7 }
   0xa   :  { %16 = vsyncpa [#allocation4], 0  ;;  %56 = vperm.xlu0 %619, %v42_v8   ;;  %v176_v11 = vld [vmem:[%s800_s4 + $0x18] sm:$0xff]  ;;  %v175_v12 = vld [vmem:[%s800_s4 + $0x10] sm:$0xff]  ;;  %vm197_vm1 = vcmask 261120   ;;  %v644_v60 = vmov 0.0  }
   0xb   :  { %46 = vperm.xlu1 %620, %v40_v9   ;;  %v174_v13 = vld [vmem:[%s800_s4 + $0x8] sm:$0xff]  ;;  %v173_v14 = vld [vmem:[%s800_s4] sm:$0xff]  ;;  %v306_v15 = vld [vmem:[%s802_s6 + $0x18] sm:$0xff]  ;;  %vm645_vm2 = vmmov 0   ;;  %s646_s10 = smov [#allocation3]   ;;  %vm512_vm3 = vcmask 57344  }
   0xc   :  { %574 = vmatmul.mubr.msk.f32.gmra.mxu0 %vm64_vm0, %v39_v10  ;;  %v305_v16 = vld [vmem:[%s802_s6 + $0x10] sm:$0xff]  ;;  %v304_v17 = vld [vmem:[%s802_s6 + $0x8] sm:$0xff]  ;;  %v303_v18 = vld [vmem:[%s802_s6] sm:$0xff]  ;;  %s520_s1 = sshll.u32 %s646_s10, 4  ;;  %s521_s1 = int_to_ptr.vmem [resolvable:$true] %s520_s1 }
   0xd   :  { %v429_v19 = vld [vmem:[#allocation2] sm:$0x1]  ;;  %v170_v37 = vld [vmem:[%s799_s3 + $0x8] sm:$0xff]  ;;  %v171_v38 = vld [vmem:[%s799_s3 + $0x10] sm:$0xff]  ;;  %s621_s11 = scalar_lea.vmem %s521_s1, 16  ;;  %p626_p1 = scmp.lt.s32.totalorder %s521_s1, %s521_s1 }
   0xe   :  { %194 = vperm.xlu0 %619, %v176_v11   ;;  %v169_v20 = vld [vmem:[%s799_s3] sm:$0xff]  ;;  %v172_v39 = vld [vmem:[%s799_s3 + $0x18] sm:$0xff]  ;;  %v300_v57 = vld [vmem:[%s801_s5 + $0x8] sm:$0xff]  ;;  %p622_p0 = scmp.ne.s32.totalorder %s521_s1, %s621_s11 }
   0xf   :  { %189 = vperm.xlu1 %620, %v175_v12   ;;  %584 = vmatprep.mubr.msk.f32.mxu1 %vm197_vm1, %v169_v20  ;;  %v299_v40 = vld [vmem:[%s801_s5] sm:$0xff]  ;;  %v301_v58 = vld [vmem:[%s801_s5 + $0x10] sm:$0xff]  ;;  %v302_v59 = vld [vmem:[%s801_s5 + $0x18] sm:$0xff] }
  0x10   :  { %598 = vmatprep.mubr.msk.f32.mxu0 %vm197_vm1, %v299_v40 }
  0x12   :  { %184 = vperm.xlu0 %619, %v174_v13   ;;  %v428_v13 = vld [vmem:[%s803_s7] sm:$0x1]  ;;  %s625_s7 = scalar_lea.vmem %s521_s1, 32 }
  0x13   :  { %179 = vperm.xlu1 %620, %v173_v14   ;;  %v435_v14 = vlaneseq  ;;  %p627_p2 = scmp.lt.s32.totalorder %s625_s7, %s621_s11 }
  0x15   :  { %p628_p3 = por %p627_p2, %p626_p1 }
  0x16   :  { %324 = vperm.xlu0 %619, %v306_v15   ;;  %v436_v15 = vshrl.u32 %v435_v14, 7 }
  0x17   :  { %319 = vperm.xlu1 %620, %v305_v16   ;;  %p629_p4 = pnand %p628_p3, %p622_p0 }
  0x18   :  { %v437_v16 = vsub.s32 0, %v436_v15 }
  0x1a   :  { %314 = vperm.xlu0 %619, %v304_v17  }
  0x1b   :  { %309 = vperm.xlu1 %620, %v303_v18  }
  0x1e   :  { %432 = vperm.xlu0 %619, %v429_v19  }
  0x81   :  { %v62_v21 = vpop.permute.xlu0 %61 }
  0x82   :  { %v52_v23 = vpop.permute.xlu1 %51 }
  0x85   :  { %v57_v27 = vpop.permute.xlu0 %56 }
  0x86   :  { %v47_v32 = vpop.permute.xlu1 %46 }
  0x89   :  { %v195_v41 = vpop.permute.xlu0 %194 }
  0x8a   :  { %v190_v43 = vpop.permute.xlu1 %189 }
  0x8d   :  { %v185_v47 = vpop.permute.xlu0 %184 }
  0x8e   :  { %v180_v52 = vpop.permute.xlu1 %179 }
  0x91   :  { %v325_v61 = vpop.permute.xlu0 %324 }
  0x92   :  { %v320_v63 = vpop.permute.xlu1 %319 }
  0x95   :  { %v315_v3 = vpop.permute.xlu0 %314 }
  0x96   :  { %v310_v8 = vpop.permute.xlu1 %309 }
  0x99   :  { %v433_v17 = vpop.permute.xlu0 %432 }
  0x9a   :  { %v438_v18 = vrot.slane %v433_v17, %v437_v16 }
  0xc8   :  { %v572_v22 = vpop.f32.mrf.mxu0 }
  0xc9   :  { %v152_v29 = vadd.f32 %v572_v22, %v52_v23 }
  0xca   :  { %v146_v24 = vpop.f32.mrf.mxu0 }
  0xcb   :  { %v147_v33 = vadd.f32 %v146_v24, %v47_v32  ;;  %v166_v35 = vmax.f32 %v152_v29, 0.0 }
  0xcc   :  { %v575_v25 = vpop.f32.mrf.mxu0 }
  0xcd   :  { %v162_v26 = vadd.f32 %v575_v25, %v62_v21  ;;  %v165_v36 = vmax.f32 %v147_v33, 0.0 }
  0xce   :  { %v156_v28 = vpop.f32.mrf.mxu0 }
  0xcf   :  { %v168_v30 = vmax.f32 %v162_v26, 0.0  ;;  %v157_v31 = vadd.f32 %v156_v28, %v57_v27 }
  0xd1   :  { %v167_v34 = vmax.f32 %v157_v31, 0.0  ;;  %576 = vmatprep.subr.mxu1 %v168_v30 }
  0xd2   :  { %577 = vmatpush3.msra.mxu1 %v168_v30 }
  0xd3   :  { %578 = vmatprep.subr.mxu1 %v167_v34 }
  0xd4   :  { %579 = vmatpush3.msra.mxu1 %v167_v34 }
  0xd5   :  { %580 = vmatprep.subr.mxu1 %v166_v35 }
  0xd6   :  { %581 = vmatpush3.msra.mxu1 %v166_v35 }
  0xd7   :  { %582 = vmatprep.subr.mxu1 %v165_v36 }
  0xd8   :  { %583 = vmatpush3.msra.mxu1 %v165_v36 }
  0xd9   :  { %585 = vmatmul.mubr.msk.f32.vlgmr.msra.gmra.mxu1 %vm197_vm1, %v170_v37  ;;  %604 = vmatprep.subr.mxu1 %v644_v60 }
  0xda   :  { %587 = vmatprep.mubr.msk.f32.mxu1 %vm197_vm1, %v171_v38 }
  0xdd   :  { %588 = vmatmul.mubr.msk.f32.gmra.mxu1 %vm197_vm1, %v172_v39 }
  0xde   :  { %612 = vmatprep.mubr.msk.f32.mxu1 %vm645_vm2, %v644_v60 }
 0x199   :  { %v586_v42 = vpop.f32.mrf.mxu1 }
 0x19a   :  { %v282_v49 = vadd.f32 %v586_v42, %v185_v47 }
 0x19b   :  { %v276_v44 = vpop.f32.mrf.mxu1 }
 0x19c   :  { %v277_v53 = vadd.f32 %v276_v44, %v180_v52  ;;  %v296_v55 = vmax.f32 %v282_v49, 0.0 }
 0x19d   :  { %v589_v45 = vpop.f32.mrf.mxu1 }
 0x19e   :  { %v292_v46 = vadd.f32 %v589_v45, %v195_v41  ;;  %v295_v56 = vmax.f32 %v277_v53, 0.0 }
 0x19f   :  { %v286_v48 = vpop.f32.mrf.mxu1 }
 0x1a0   :  { %v298_v50 = vmax.f32 %v292_v46, 0.0  ;;  %v287_v51 = vadd.f32 %v286_v48, %v190_v43 }
 0x1a2   :  { %v297_v54 = vmax.f32 %v287_v51, 0.0  ;;  %590 = vmatprep.subr.mxu0 %v298_v50 }
 0x1a3   :  { %591 = vmatpush3.msra.mxu0 %v298_v50 }
 0x1a4   :  { %592 = vmatprep.subr.mxu0 %v297_v54 }
 0x1a5   :  { %593 = vmatpush3.msra.mxu0 %v297_v54 }
 0x1a6   :  { %594 = vmatprep.subr.mxu0 %v296_v55 }
 0x1a7   :  { %595 = vmatpush3.msra.mxu0 %v296_v55 }
 0x1a8   :  { %596 = vmatprep.subr.mxu0 %v295_v56 }
 0x1a9   :  { %597 = vmatpush3.msra.mxu0 %v295_v56 }
 0x1aa   :  { %599 = vmatmul.mubr.msk.f32.vlgmr.msra.gmra.mxu0 %vm197_vm1, %v300_v57 }
 0x1ab   :  { %601 = vmatprep.mubr.msk.f32.mxu0 %vm197_vm1, %v301_v58 }
 0x1ae   :  { %602 = vmatmul.mubr.msk.f32.gmra.mxu0 %vm197_vm1, %v302_v59 }
 0x26a   :  { %v600_v62 = vpop.f32.mrf.mxu0 }
 0x26b   :  { %v411_v5 = vadd.f32 %v600_v62, %v315_v3 }
 0x26c   :  { %v405_v0 = vpop.f32.mrf.mxu0 }
 0x26d   :  { %v406_v9 = vadd.f32 %v405_v0, %v310_v8  ;;  %v425_v11 = vmax.f32 %v411_v5, 0.0 }
 0x26e   :  { %v603_v1 = vpop.f32.mrf.mxu0 }
 0x26f   :  { %v421_v2 = vadd.f32 %v603_v1, %v325_v61  ;;  %v424_v12 = vmax.f32 %v406_v9, 0.0 }
 0x270   :  { %v415_v4 = vpop.f32.mrf.mxu0 }
 0x271   :  { %v427_v6 = vmax.f32 %v421_v2, 0.0  ;;  %v416_v7 = vadd.f32 %v415_v4, %v320_v63 }
 0x273   :  { %v426_v10 = vmax.f32 %v416_v7, 0.0  ;;  %605 = vmatpush3.msra.mxu1 %v427_v6 }
 0x274   :  { %606 = vmatprep.subr.mxu1 %v644_v60 }
 0x275   :  { %607 = vmatpush3.msra.mxu1 %v426_v10 }
 0x276   :  { %608 = vmatprep.subr.mxu1 %v644_v60 }
 0x277   :  { %609 = vmatpush3.msra.mxu1 %v425_v11 }
 0x278   :  { %610 = vmatprep.subr.mxu1 %v644_v60 }
 0x279   :  { %611 = vmatpush3.msra.mxu1 %v424_v12 }
 0x27a   :  { %613 = vmatmul.mubr.msk.f32.vlgmr.msra.gmra.mxu1 %vm197_vm1, %v428_v13 }
 0x33a   :  { %v508_v19 = vpop.f32.mrf.mxu1 }
 0x33b   :  { %v509_v20 = vadd.f32 %v508_v19, %v438_v18 }
 0x33c   :  { %v614_v21 = vpop.f32.mrf.mxu1 }
 0x33d   :  { %513 = vst.msk [vmem:[#allocation3] sm:$0x1] %vm512_vm3, %v509_v20 }
 0x33e   :  { %632 = shalt.err (!%p629_p4)
}
 0x33f   :  { %523 = dma.vmem_to_hbm [thread:$0]  %s521_s1, 16, %s805_s9, [#allocation4]  }
 0x340   :  { %641 = dma.done.wait [#allocation4], 16  }
 0x341   :  { %642 = vsyncadd [#allocation4], 4294967280 }
 0x342   :  { %527 = vsyncpa [#allocation4], 1 }

</bundles_post_ra>
